<compile_context>
chip_gen: v7x
topology: tpu7x:2x2x1
jax: 0.10.0
libtpu: 0.0.40
codegen_flags: <defaults>
</compile_context>

<pallas_src>
import functools

import jax
import jax.numpy as jnp
from jax import lax
from jax.experimental import pallas as pl
from jax.experimental.pallas import tpu as pltpu

# Plain Python float (NOT jnp.float32(...): that is a jax.Array and would be captured
# as a kernel constant, which pallas_call rejects).
_BIG = 1e30


def _triplet_row_block_kernel(x_ref, sqh_col_ref, t_col_ref, sq_row_ref, t_row_ref,
                              o_ref, *, margin, n_real, tr, tc, num_main, rem):
    """One anchor-row block (TR anchors on the lane axis) against all columns.

    x_ref        : (n_pad, d)  resident embedding matrix (f32 or bf16), loaded once
    sqh_col_ref  : (n_pad, 1)  0.5*||x||^2 per column (padded columns hold +BIG/2)
    t_col_ref    : (n_pad, 1)  int32 labels per column (padded columns hold INT32_MIN)
    sq_row_ref   : (1, tr)     ||x||^2 for this anchor block (lane layout)
    t_row_ref    : (1, tr)     labels for this anchor block (lane layout)
    o_ref        : (1, 1, tr)  per-anchor hinge loss (padded anchors -> 0)
    """
    i = pl.program_id(0)
    row_start = pl.multiple_of(i * tr, tr)
    x_row = x_ref[pl.ds(row_start, tr), :]           # (tr, d): this block's anchors
    t_row = t_row_ref[...]                           # (1, tr)

    def scan_cols(start, size, m_pos, m_neg):
        xc  = x_ref[pl.ds(start, size), :]           # (size, d)
        sqc = sqh_col_ref[pl.ds(start, size), :]     # (size, 1)
        tcl = t_col_ref[pl.ds(start, size), :]       # (size, 1)
        # Transposed Gram chunk g[c, r] = <x_c, x_r>: contract the feature dims
        # directly, so no transposes / relayouts appear inside the kernel.
        g = lax.dot_general(xc, x_row, (((1,), (1,)), ((), ())),
                            preferred_element_type=jnp.float32)       # (size, tr)
        # Monotone surrogate of the squared distance: dist2 = 2*s + ||x_r||^2,
        # so the per-anchor arg-max/min over columns is unchanged.
        s = sqc - g
        same = tcl == t_row                                            # (size, tr)
        pos = jnp.where(same, s, -_BIG)       # hardest-positive candidates
        neg = jnp.where(same, _BIG, s)        # hardest-negative candidates
        m_pos = jnp.maximum(m_pos, jnp.max(pos, axis=0, keepdims=True))
        m_neg = jnp.minimum(m_neg, jnp.min(neg, axis=0, keepdims=True))
        return m_pos, m_neg

    m_pos = jnp.full((1, tr), -_BIG, jnp.float32)
    m_neg = jnp.full((1, tr), _BIG, jnp.float32)

    if num_main > 0:                                  # static Python branch
        def body(c, carry):
            start = pl.multiple_of(c * tc, tc)
            return scan_cols(start, tc, *carry)
        m_pos, m_neg = lax.fori_loop(0, num_main, body, (m_pos, m_neg),
                                     unroll=num_main <= 8)
    if rem > 0:                                       # static, 8-aligned remainder chunk
        m_pos, m_neg = scan_cols(num_main * tc, rem, m_pos, m_neg)

    # clamp + sqrt only on the two reduced per-anchor vectors (monotone -> identical
    # selection to clamp(1e-12).sqrt() applied element-wise before the max/min).
    sq_row = sq_row_ref[...]                                           # (1, tr)
    d_ap = jnp.sqrt(jnp.maximum(2.0 * m_pos + sq_row, 1e-12))
    d_an = jnp.sqrt(jnp.maximum(2.0 * m_neg + sq_row, 1e-12))
    hinge = jnp.maximum(d_ap - d_an + margin, 0.0)                     # MarginRankingLoss, y=+1
    row_ids = row_start + lax.broadcasted_iota(jnp.int32, (1, tr), 1)
    hinge = jnp.where(row_ids < n_real, hinge, 0.0)                    # zero padded anchors
    o_ref[...] = hinge.reshape(1, 1, tr)                               # lane-dense store


def population_aware_triplet_loss(inputs, targets, *, margin=0.3, loss_weight=1.0,
                                  block_rows=None, block_cols=512, use_bf16_gram=False):
    """inputs: (N, D) float, targets: (N,) int -> scalar float32 loss.

    use_bf16_gram: cast the Gram operand to bf16 (f32 accumulation) for ~4-8x MXU
    throughput on v6e/v7x; norms are computed from the same bf16-cast operand so the
    surrogate selection stays self-consistent.  Default False = exact f32 path.
    """
    if isinstance(loss_weight, (int, float)) and loss_weight == 0:
        return jnp.zeros((), jnp.float32)   # mirrors the PyTorch early-return

    n, d = inputs.shape
    if block_rows is None:
        block_rows = 256 if (use_bf16_gram and n > 128) else 128   # per review: TR=256 w/ bf16
    tr = int(block_rows)
    tc = max(8, (int(block_cols) // 8) * 8)                        # column chunk, 8-aligned

    n_pad = pl.cdiv(n, tr) * tr                 # anchor rows padded to the lane tile
    gr = n_pad // tr
    col_align = 16 if use_bf16_gram else 8      # sublane packing of the column operand
    n_col = pl.cdiv(n, col_align) * col_align   # columns actually reduced over (<= n_pad)
    num_main = n_col // tc
    rem = n_col - num_main * tc

    x = jnp.pad(inputs.astype(jnp.float32), ((0, n_pad - n), (0, 0)))
    pad_label = jnp.iinfo(jnp.int32).min        # sentinel outside any realistic label range
    t = jnp.pad(targets.astype(jnp.int32), (0, n_pad - n), constant_values=pad_label)

    x_k = x.astype(jnp.bfloat16) if use_bf16_gram else x
    xf = x_k.astype(jnp.float32)                # norms from the SAME operand the MXU sees
    sq = jnp.sum(xf * xf, axis=1)               # (n_pad,)
    sq = jnp.where(jnp.arange(n_pad) < n, sq, _BIG)   # padded columns self-exclude (neg min)

    sqh_col = (0.5 * sq).reshape(n_pad, 1)      # column (sublane) layout, pre-halved
    t_col = t.reshape(n_pad, 1)
    sq_row = sq.reshape(1, n_pad)               # anchor (lane) layout
    t_row = t.reshape(1, n_pad)

    kernel = functools.partial(
        _triplet_row_block_kernel, margin=float(margin), n_real=n,
        tr=tr, tc=tc, num_main=num_main, rem=rem)

    hinge = pl.pallas_call(
        kernel,
        out_shape=jax.ShapeDtypeStruct((gr, 1, tr), jnp.float32),
        grid_spec=pltpu.PrefetchScalarGridSpec(
            num_scalar_prefetch=0,
            grid=(gr,),
            in_specs=[
                pl.BlockSpec((n_pad, d), lambda i: (0, 0)),   # x: resident, HBM-read once
                pl.BlockSpec((n_pad, 1), lambda i: (0, 0)),   # 0.5*||x||^2, column layout
                pl.BlockSpec((n_pad, 1), lambda i: (0, 0)),   # targets, column layout
                pl.BlockSpec((1, tr),    lambda i: (0, i)),   # ||x||^2, anchor layout
                pl.BlockSpec((1, tr),    lambda i: (0, i)),   # targets, anchor layout
            ],
            out_specs=pl.BlockSpec((1, 1, tr), lambda i: (i, 0, 0)),
        ),
        compiler_params=pltpu.CompilerParams(
            dimension_semantics=("parallel",),          # row blocks across TCs on v7x
            vmem_limit_bytes=40 * 1024 * 1024,          # safe on v7x's 64 MiB VMEM
        ),
    )(x_k, sqh_col, t_col, sq_row, t_row)

    return loss_weight * jnp.sum(hinge) / n


def _reference(inputs, targets, margin=0.3, loss_weight=1.0):
    # pure-JAX reference (same math as the PyTorch default path)
    sq = jnp.sum(inputs * inputs, axis=1, keepdims=True)
    gram = lax.dot_general(inputs, inputs, (((1,), (1,)), ((), ())),
                           precision=lax.Precision.HIGHEST,
                           preferred_element_type=jnp.float32)
    dist = jnp.sqrt(jnp.maximum(sq + sq.T - 2.0 * gram, 1e-12))
    same = targets[:, None] == targets[None, :]
    d_ap = jnp.max(jnp.where(same, dist, -_BIG), axis=1)
    d_an = jnp.min(jnp.where(same, _BIG, dist), axis=1)
    return loss_weight * jnp.mean(jnp.maximum(d_ap - d_an + margin, 0.0))


if __name__ == "__main__":
    key = jax.random.PRNGKey(0)
    k1, k2, k3 = jax.random.split(key, 3)

    # Test 1: tiny batch, exercises column padding to the 8-sublane tile (10 -> 16 cols)
    n1, d1 = 10, 128
    x1 = jax.random.normal(k1, (n1, d1), dtype=jnp.float32)
    t1 = jnp.array([0, 0, 1, 1, 2, 2, 3, 3, 4, 4], dtype=jnp.int32)
    loss1 = population_aware_triplet_loss(x1, t1, margin=0.3, loss_weight=1.0)
    jax.block_until_ready(loss1)
    ref1 = _reference(x1, t1)
    assert abs(float(loss1) - float(ref1)) < 2e-3 * max(1.0, abs(float(ref1))), (loss1, ref1)

    # Test 2: row padding (200 -> 256), 2 row blocks, single remainder column chunk
    n2, d2 = 200, 256
    x2 = jax.random.normal(k2, (n2, d2), dtype=jnp.float32)
    t2 = jax.random.randint(k3, (n2,), 0, 8, dtype=jnp.int32)
    loss2 = population_aware_triplet_loss(x2, t2, margin=0.3, loss_weight=1.0)
    jax.block_until_ready(loss2)
    ref2 = _reference(x2, t2)
    assert abs(float(loss2) - float(ref2)) < 2e-3 * max(1.0, abs(float(ref2))), (loss2, ref2)

    # Test 3: small column chunks -> exercises the in-kernel fori_loop + remainder path
    loss3 = population_aware_triplet_loss(x2, t2, margin=0.3, loss_weight=1.0,
                                          block_cols=64)
    jax.block_until_ready(loss3)
    assert abs(float(loss3) - float(ref2)) < 2e-3 * max(1.0, abs(float(ref2))), (loss3, ref2)

    # Test 4: bf16 Gram path (v6e/v7x throughput mode) -- sanity run only
    loss4 = population_aware_triplet_loss(x2, t2, margin=0.3, loss_weight=1.0,
                                          use_bf16_gram=True)
    jax.block_until_ready(loss4)
    assert bool(jnp.isfinite(loss4)) and float(loss4) >= 0.0, loss4

    print("KERNEL_OK")
</pallas_src>

<mosaic_0001>
module attributes {stable_mosaic.version = 11 : i64} {
  func.func @_triplet_row_block_kernel(%arg0: i32, %arg1: memref<128x128xf32, #tpu.memory_space<vmem>>, %arg2: memref<128x1xf32, #tpu.memory_space<vmem>>, %arg3: memref<128x1xi32, #tpu.memory_space<vmem>>, %arg4: memref<1x128xf32, #tpu.memory_space<vmem>>, %arg5: memref<1x128xi32, #tpu.memory_space<vmem>>, %arg6: memref<1x1x128xf32, #tpu.memory_space<vmem>>) attributes {dimension_semantics = [#tpu.dimension_semantics<parallel>], iteration_bounds = array<i64: 1>, scalar_prefetch = 0 : i64, scratch_operands = 0 : i64, tpu.core_type = #tpu.core_type<tc>, window_params = [{pipeline_mode = #tpu.pipeline_mode<synchronous>, transform_indices = @transform_0, window_bounds = array<i64: 128, 128>}, {pipeline_mode = #tpu.pipeline_mode<synchronous>, transform_indices = @transform_1, window_bounds = array<i64: 128, 1>}, {pipeline_mode = #tpu.pipeline_mode<synchronous>, transform_indices = @transform_2, window_bounds = array<i64: 128, 1>}, {transform_indices = @transform_3, window_bounds = array<i64: 1, 128>}, {transform_indices = @transform_4, window_bounds = array<i64: 1, 128>}, {transform_indices = @transform_5, window_bounds = array<i64: 1, 1, 128>}]} {
    %c128_i32 = arith.constant 128 : i32
    %0 = arith.muli %arg0, %c128_i32 : i32
    %1 = tpu.assume_multiple %0, 128 : i32
    %2 = arith.index_cast %1 : i32 to index
    %c0 = arith.constant 0 : index
    %3 = vector.load %arg1[%2, %c0] : memref<128x128xf32, #tpu.memory_space<vmem>>, vector<128x128xf32>
    %c0_0 = arith.constant 0 : index
    %c0_1 = arith.constant 0 : index
    %4 = vector.load %arg5[%c0_0, %c0_1] : memref<1x128xi32, #tpu.memory_space<vmem>>, vector<1x128xi32>
    %cst = arith.constant -1.000000e+30 : f32
    %5 = vector.broadcast %cst : f32 to vector<1x128xf32>
    %cst_2 = arith.constant 1.000000e+30 : f32
    %6 = vector.broadcast %cst_2 : f32 to vector<1x128xf32>
    %c0_3 = arith.constant 0 : index
    %c0_4 = arith.constant 0 : index
    %7 = vector.load %arg1[%c0_3, %c0_4] : memref<128x128xf32, #tpu.memory_space<vmem>>, vector<16x128xf32>
    %c0_5 = arith.constant 0 : index
    %c0_6 = arith.constant 0 : index
    %8 = vector.load %arg2[%c0_5, %c0_6] : memref<128x1xf32, #tpu.memory_space<vmem>>, vector<16x1xf32>
    %c0_7 = arith.constant 0 : index
    %c0_8 = arith.constant 0 : index
    %9 = vector.load %arg3[%c0_7, %c0_8] : memref<128x1xi32, #tpu.memory_space<vmem>>, vector<16x1xi32>
    %cst_9 = arith.constant dense<0.000000e+00> : vector<16x128xf32>
    %10 = tpu.matmul %7, %3, %cst_9 {dimension_numbers = #tpu.dot_dimension_numbers<[1], [1], [0], [0], [0, 0, 1, 0], [], []>} : vector<16x128xf32>, vector<128x128xf32>, vector<16x128xf32> -> vector<16x128xf32>
    %11 = vector.broadcast %8 : vector<16x1xf32> to vector<16x128xf32>
    %12 = arith.subf %11, %10 : vector<16x128xf32>
    %13 = vector.broadcast %9 : vector<16x1xi32> to vector<16x128xi32>
    %14 = vector.broadcast %4 : vector<1x128xi32> to vector<16x128xi32>
    %15 = arith.cmpi eq, %13, %14 : vector<16x128xi32>
    %cst_10 = arith.constant -1.000000e+30 : f32
    %16 = vector.broadcast %cst_10 : f32 to vector<16x128xf32>
    %17 = arith.select %15, %12, %16 : vector<16x128xi1>, vector<16x128xf32>
    %cst_11 = arith.constant 1.000000e+30 : f32
    %18 = vector.broadcast %cst_11 : f32 to vector<16x128xf32>
    %19 = arith.select %15, %18, %12 : vector<16x128xi1>, vector<16x128xf32>
    %cst_12 = arith.constant dense<0xFF800000> : vector<128xf32>
    %20 = vector.multi_reduction <maximumf>, %17, %cst_12 [0] : vector<16x128xf32> to vector<128xf32>
    %21 = vector.shape_cast %20 : vector<128xf32> to vector<1x128xf32>
    %22 = arith.maximumf %5, %21 : vector<1x128xf32>
    %cst_13 = arith.constant dense<0x7F800000> : vector<128xf32>
    %23 = vector.multi_reduction <minimumf>, %19, %cst_13 [0] : vector<16x128xf32> to vector<128xf32>
    %24 = vector.shape_cast %23 : vector<128xf32> to vector<1x128xf32>
    %25 = arith.minimumf %6, %24 : vector<1x128xf32>
    %c0_14 = arith.constant 0 : index
    %c0_15 = arith.constant 0 : index
    %26 = vector.load %arg4[%c0_14, %c0_15] : memref<1x128xf32, #tpu.memory_space<vmem>>, vector<1x128xf32>
    %cst_16 = arith.constant 2.000000e+00 : f32
    %27 = vector.broadcast %cst_16 : f32 to vector<1x128xf32>
    %28 = arith.mulf %27, %22 : vector<1x128xf32>
    %29 = arith.addf %28, %26 : vector<1x128xf32>
    %cst_17 = arith.constant 9.99999996E-13 : f32
    %30 = vector.broadcast %cst_17 : f32 to vector<1x128xf32>
    %31 = arith.maximumf %29, %30 : vector<1x128xf32>
    %32 = math.sqrt %31 : vector<1x128xf32>
    %cst_18 = arith.constant 2.000000e+00 : f32
    %33 = vector.broadcast %cst_18 : f32 to vector<1x128xf32>
    %34 = arith.mulf %33, %25 : vector<1x128xf32>
    %35 = arith.addf %34, %26 : vector<1x128xf32>
    %cst_19 = arith.constant 9.99999996E-13 : f32
    %36 = vector.broadcast %cst_19 : f32 to vector<1x128xf32>
    %37 = arith.maximumf %35, %36 : vector<1x128xf32>
    %38 = math.sqrt %37 : vector<1x128xf32>
    %39 = arith.subf %32, %38 : vector<1x128xf32>
    %cst_20 = arith.constant 3.000000e-01 : f32
    %40 = vector.broadcast %cst_20 : f32 to vector<1x128xf32>
    %41 = arith.addf %39, %40 : vector<1x128xf32>
    %cst_21 = arith.constant 0.000000e+00 : f32
    %42 = vector.broadcast %cst_21 : f32 to vector<1x128xf32>
    %43 = arith.maximumf %41, %42 : vector<1x128xf32>
    %44 = tpu.iota {dimensions = array<i32: 1>} : vector<1x128xi32>
    %45 = vector.broadcast %1 : i32 to vector<1x128xi32>
    %46 = arith.addi %45, %44 : vector<1x128xi32>
    %c10_i32 = arith.constant 10 : i32
    %47 = vector.broadcast %c10_i32 : i32 to vector<1x128xi32>
    %48 = arith.cmpi slt, %46, %47 : vector<1x128xi32>
    %cst_22 = arith.constant 0.000000e+00 : f32
    %49 = vector.broadcast %cst_22 : f32 to vector<1x128xf32>
    %50 = arith.select %48, %43, %49 : vector<1x128xi1>, vector<1x128xf32>
    %51 = vector.shape_cast %50 : vector<1x128xf32> to vector<1x1x128xf32>
    %c0_23 = arith.constant 0 : index
    %c0_24 = arith.constant 0 : index
    %c0_25 = arith.constant 0 : index
    %52 = vector.load %arg6[%c0_23, %c0_24, %c0_25] : memref<1x1x128xf32, #tpu.memory_space<vmem>>, vector<1x1x128xf32>
    tpu.vector_store %arg6[%c0_23, %c0_24, %c0_25], %51 {strides = array<i32>} : memref<1x1x128xf32, #tpu.memory_space<vmem>>, vector<1x1x128xf32>,
    return
  }
  func.func @transform_0(%arg0: i32) -> (i32, i32) {
    %c0_i32 = arith.constant 0 : i32
    %c0_i32_0 = arith.constant 0 : i32
    %c0_i32_1 = arith.constant 0 : i32
    return %c0_i32, %c0_i32_0 : i32, i32
  }
  func.func @transform_1(%arg0: i32) -> (i32, i32) {
    %c0_i32 = arith.constant 0 : i32
    %c0_i32_0 = arith.constant 0 : i32
    %c0_i32_1 = arith.constant 0 : i32
    return %c0_i32, %c0_i32_0 : i32, i32
  }
  func.func @transform_2(%arg0: i32) -> (i32, i32) {
    %c0_i32 = arith.constant 0 : i32
    %c0_i32_0 = arith.constant 0 : i32
    %c0_i32_1 = arith.constant 0 : i32
    return %c0_i32, %c0_i32_0 : i32, i32
  }
  func.func @transform_3(%arg0: i32) -> (i32, i32) {
    %c0_i32 = arith.constant 0 : i32
    %c0_i32_0 = arith.constant 0 : i32
    return %c0_i32, %arg0 : i32, i32
  }
  func.func @transform_4(%arg0: i32) -> (i32, i32) {
    %c0_i32 = arith.constant 0 : i32
    %c0_i32_0 = arith.constant 0 : i32
    return %c0_i32, %arg0 : i32, i32
  }
  func.func @transform_5(%arg0: i32) -> (i32, i32, i32) {
    %c0_i32 = arith.constant 0 : i32
    %c0_i32_0 = arith.constant 0 : i32
    %c0_i32_1 = arith.constant 0 : i32
    return %arg0, %c0_i32, %c0_i32_0 : i32, i32, i32
  }
}

</mosaic_0001>

<bundles_post_ra>
// kernel: tpu_custom_call.1
= control target key start
LH: loop header
LB: loop body
LE: loop exit
PB: predicated region body
PF: predicated region fallthrough
CT: control target
= control target key end

     0   :  { %v328_v5 = vmov 0   ;;  %s438_s0 = inlined_call_operand.vmem [shape: f32[128,128], index: 0, kind: input, shape index: {}]   ;;  %s439_s1 = inlined_call_operand.vmem [shape: f32[128,1], index: 1, kind: input, shape index: {}]   ;;  %s440_s2 = inlined_call_operand.vmem [shape: s32[128,1], index: 2, kind: input, shape index: {}]   ;;  %s441_s3 = inlined_call_operand.vmem [shape: f32[1,128], index: 3, kind: input, shape index: {}]   ;;  %s442_s4 = inlined_call_operand.vmem [shape: s32[1,128], index: 4, kind: input, shape index: {}]   ;;  %s443_s5 = inlined_call_operand.hbm [shape: f32[1,1,128], index: 5, kind: output, shape index: {}]  }
   0x1   :  { %v23_v0 = vld [vmem:[%s438_s0] sm:$0xff]  ;;  %v24_v1 = vld [vmem:[%s438_s0 + $0x8] sm:$0xff]  ;;  %v25_v2 = vld [vmem:[%s438_s0 + $0x10] sm:$0xff]  ;;  %298 = vset.pattern.permute.xlu0 %v328_v5  ;;  %299 = vset.pattern.permute.xlu1 %v328_v5 }
   0x2   :  { %v264_v3 = vpack.c.bf16 %v24_v1, %v23_v0  ;;  %v26_v4 = vld [vmem:[%s438_s0 + $0x18] sm:$0xff]  ;;  %261 = vmatprep.mubr.f32.mxu0 %v23_v0  ;;  %v42_v7 = vld [vmem:[%s439_s1] sm:$0xff]  ;;  %v28_v10 = vld [vmem:[%s438_s0 + $0x28] sm:$0xff] }
   0x3   :  { %v268_v6 = vpack.c.bf16 %v26_v4, %v25_v2  ;;  %v44_v8 = vld [vmem:[%s440_s2] sm:$0xff]  ;;  %123 = vperm.xlu0 %298, %v42_v7   ;;  %v43_v11 = vld [vmem:[%s439_s1 + $0x8] sm:$0xff] }
   0x4   :  { %265 = vmatprep.subr.bf16.mxu0 %v264_v3  ;;  %v27_v9 = vld [vmem:[%s438_s0 + $0x20] sm:$0xff]  ;;  %134 = vperm.xlu1 %299, %v44_v8   ;;  %v45_v12 = vld [vmem:[%s440_s2 + $0x8] sm:$0xff] }
   0x5   :  { %267 = vmatpush3.bf16.xpose.msra.mxu0 %v264_v3 }
   0x6   :  { %269 = vmatprep.subr.bf16.mxu0 %v268_v6 }
   0x7   :  { %10 = vsyncpa [#allocation3], 0  ;;  %v272_v13 = vpack.c.bf16 %v28_v10, %v27_v9  ;;  %128 = vperm.xlu0 %298, %v43_v11   ;;  %v29_v14 = vld [vmem:[%s438_s0 + $0x30] sm:$0xff]  ;;  %v30_v15 = vld [vmem:[%s438_s0 + $0x38] sm:$0xff]  ;;  %v189_v4 = vlaneseq }
   0x8   :  { %137 = vperm.xlu1 %299, %v45_v12   ;;  %v276_v16 = vpack.c.bf16 %v30_v15, %v29_v14  ;;  %v31_v17 = vld [vmem:[%s438_s0 + $0x40] sm:$0xff]  ;;  %v32_v18 = vld [vmem:[%s438_s0 + $0x48] sm:$0xff]  ;;  %v33_v20 = vld [vmem:[%s438_s0 + $0x50] sm:$0xff] }
   0x9   :  { %v280_v19 = vpack.c.bf16 %v32_v18, %v31_v17  ;;  %v34_v21 = vld [vmem:[%s438_s0 + $0x58] sm:$0xff]  ;;  %v35_v23 = vld [vmem:[%s438_s0 + $0x60] sm:$0xff]  ;;  %v36_v24 = vld [vmem:[%s438_s0 + $0x68] sm:$0xff]  ;;  %v190_v12 = vand.u32 127, %v189_v4 }
   0xa   :  { %v284_v22 = vpack.c.bf16 %v34_v21, %v33_v20  ;;  %v288_v25 = vpack.c.bf16 %v36_v24, %v35_v23  ;;  %v37_v26 = vld [vmem:[%s438_s0 + $0x70] sm:$0xff]  ;;  %v38_v27 = vld [vmem:[%s438_s0 + $0x78] sm:$0xff]  ;;  %v210_v31 = vld [vmem:[%s442_s4] ss:$0 sm:$0xff] }
   0xb   :  { %v292_v28 = vpack.c.bf16 %v38_v27, %v37_v26  ;;  %v165_v58 = vld [vmem:[%s441_s3] sm:$0x1]  ;;  %s329_s3 = smov [#allocation2]   ;;  %vm193_vm6 = vcmp.lt.s32.totalorder %v190_v12, 10 }
   0xc   :  { %s202_s8 = sshll.u32 %s329_s3, 4  ;;  %s203_s8 = int_to_ptr.vmem [resolvable:$true] %s202_s8 }
   0xd   :  { %271 = vmatpush3.bf16.xpose.msra.mxu0 %v268_v6  ;;  %s304_s9 = scalar_lea.vmem %s203_s8, 16  ;;  %s308_s10 = scalar_lea.vmem %s203_s8, 32 }
   0xe   :  { %273 = vmatprep.subr.bf16.mxu0 %v272_v13  ;;  %p305_p0 = scmp.ne.s32.totalorder %s203_s8, %s304_s9  ;;  %p309_p1 = scmp.lt.s32.totalorder %s203_s8, %s203_s8 }
   0xf   :  { %p310_p2 = scmp.lt.s32.totalorder %s308_s10, %s304_s9 }
  0x11   :  { %p311_p3 = por %p310_p2, %p309_p1 }
  0x13   :  { %p312_p4 = pnand %p311_p3, %p305_p0 }
  0x15   :  { %275 = vmatpush3.bf16.xpose.msra.mxu0 %v272_v13 }
  0x16   :  { %277 = vmatprep.subr.bf16.mxu0 %v276_v16 }
  0x1d   :  { %279 = vmatpush3.bf16.xpose.msra.mxu0 %v276_v16 }
  0x1e   :  { %281 = vmatprep.subr.bf16.mxu0 %v280_v19 }
  0x25   :  { %283 = vmatpush3.bf16.xpose.msra.mxu0 %v280_v19 }
  0x26   :  { %285 = vmatprep.subr.bf16.mxu0 %v284_v22 }
  0x2d   :  { %287 = vmatpush3.bf16.xpose.msra.mxu0 %v284_v22 }
  0x2e   :  { %289 = vmatprep.subr.bf16.mxu0 %v288_v25 }
  0x35   :  { %291 = vmatpush3.bf16.xpose.msra.mxu0 %v288_v25 }
  0x36   :  { %293 = vmatprep.subr.bf16.mxu0 %v292_v28 }
  0x3d   :  { %295 = vmatpush3.bf16.xpose.msra.mxu0 %v292_v28 }
  0x44   :  { %262 = vmatmul.mubr.f32.vlgmr.msra.gmra.mrb[0].mxu0 %v24_v1 }
  0x82   :  { %v124_v30 = vpop.permute.xlu0 %123 }
  0x83   :  { %v135_v29 = vpop.permute.xlu1 %134 }
  0x84   :  { %vm143_vm1 = vcmp.eq.s32.totalorder %v135_v29, %v210_v31 }
  0x86   :  { %v129_v33 = vpop.permute.xlu0 %128 }
  0x87   :  { %v138_v32 = vpop.permute.xlu1 %137 }
  0x88   :  { %vm144_vm0 = vcmp.eq.s32.totalorder %v138_v32, %v210_v31 }
 0x117   :  { %v263_v34 = vpop.f32.mrb[0].mxu0 }
 0x118   :  { %v132_v35 = vsub.f32 %v129_v33, %v263_v34  ;;  %v112_v36 = vpop.f32.mrb[1].mxu0 }
 0x119   :  { %v131_v37 = vsub.f32 %v124_v30, %v112_v36 }
 0x11a   :  { %v146_v38 = vsel %vm144_vm0, %v132_v35, -1e+30  ;;  %v148_v39 = vsel %vm144_vm0, 1e+30, %v132_v35 }
 0x11b   :  { %v145_v40 = vsel %vm143_vm1, %v131_v37, -1e+30  ;;  %v147_v41 = vsel %vm143_vm1, 1e+30, %v131_v37 }
 0x11c   :  { %v149_v42 = vmax.f32 %v145_v40, %v146_v38  ;;  %v157_v43 = vmin.f32 %v147_v41, %v148_v39 }
 0x11e   :  { %v150_v44 = vrot.slane %v149_v42, 4  ;;  %v158_v45 = vrot.slane %v157_v43, 4 }
 0x120   :  { %v151_v46 = vmax.f32 %v149_v42, %v150_v44  ;;  %v159_v47 = vmin.f32 %v157_v43, %v158_v45 }
 0x122   :  { %v152_v48 = vrot.slane %v151_v46, 2  ;;  %v160_v49 = vrot.slane %v159_v47, 2 }
 0x124   :  { %v153_v50 = vmax.f32 %v151_v46, %v152_v48  ;;  %v161_v51 = vmin.f32 %v159_v47, %v160_v49 }
 0x126   :  { %v154_v52 = vrot.slane %v153_v50, 1  ;;  %v162_v53 = vrot.slane %v161_v51, 1 }
 0x128   :  { %v155_v54 = vmax.f32 %v153_v50, %v154_v52  ;;  %v163_v55 = vmin.f32 %v161_v51, %v162_v53 }
 0x12a   :  { %v156_v56 = vmax.f32 %v155_v54, -1e+30  ;;  %v164_v57 = vmin.f32 %v163_v55, 1e+30 }
 0x12c   :  { %v166_v59 = vmul.f32 2.0, %v156_v56  ;;  %v176_v60 = vmul.f32 2.0, %v164_v57 }
 0x12e   :  { %v167_v61 = vadd.f32 %v166_v59, %v165_v58  ;;  %v177_v62 = vadd.f32 %v176_v60, %v165_v58 }
 0x130   :  { %v168_v63 = vmax.f32 %v167_v61, 1e-12  ;;  %v178_v0 = vmax.f32 %v177_v62, 1e-12 }
 0x132   :  { %300 = vrsqrt.f32 %v168_v63  ;;  %vm171_vm2 = vcmp.eq.f32.partialorder %v168_v63, inf  ;;  %v174_v5 = vand.u32 2147483648, %v168_v63  ;;  %vm173_vm3 = vcmp.eq.f32.partialorder %v168_v63, 0.0 }
 0x133   :  { %302 = vrsqrt.f32 %v178_v0  ;;  %vm181_vm4 = vcmp.eq.f32.partialorder %v178_v0, inf  ;;  %v184_v8 = vand.u32 2147483648, %v178_v0  ;;  %vm183_vm5 = vcmp.eq.f32.partialorder %v178_v0, 0.0 }
 0x13c   :  { %v301_v1 = vpop.eup %300 }
 0x13d   :  { %v303_v2 = vpop.eup %302  ;;  %v170_v3 = vmul.f32 %v301_v1, %v168_v63 }
 0x13e   :  { %v180_v6 = vmul.f32 %v303_v2, %v178_v0 }
 0x13f   :  { %v172_v7 = vsel %vm171_vm2, %v168_v63, %v170_v3 }
 0x140   :  { %v175_v9 = vsel %vm173_vm3, %v174_v5, %v172_v7  ;;  %v182_v10 = vsel %vm181_vm4, %v178_v0, %v180_v6 }
 0x141   :  { %v185_v11 = vsel %vm183_vm5, %v184_v8, %v182_v10 }
 0x142   :  { %v186_v13 = vsub.f32 %v175_v9, %v185_v11 }
 0x144   :  { %v187_v14 = vadd.f32 0.3, %v186_v13 }
 0x146   :  { %v188_v15 = vmax.f32 %v187_v14, 0.0 }
 0x148   :  { %v194_v16 = vsel %vm193_vm6, %v188_v15, 0.0 }
 0x149   :  { %195 = vst [vmem:[#allocation2] sm:$0x1] %v194_v16 }
 0x14a   :  { %315 = shalt.err (!%p312_p4)
}
 0x14b   :  { %s316_s13 = scalar_lea.hbm %s443_s5, 16 }
 0x14c   :  { %p317_p5 = scmp.ne.s32.totalorder %s443_s5, %s316_s13  ;;  %p320_p6 = scmp.lt.u32.totalorder %s316_s13, %s443_s5 }
 0x14e   :  { %p322_p7 = pnand %p320_p6, %p317_p5 }
 0x150   :  { %325 = shalt.err (!%p322_p7)
}
 0x151   :  { %205 = dma.vmem_to_hbm [thread:$0]  %s203_s8, 16, %s443_s5, [#allocation3]  }
 0x152   :  { %326 = dma.done.wait [#allocation3], 16  }
 0x153   :  { %327 = vsyncadd [#allocation3], 4294967280 }
 0x154   :  { %209 = vsyncpa [#allocation3], 1 }

</bundles_post_ra>
